<compile_context>
chip_gen: v6e
topology: v6e:2x2x1
jax: 0.10.0
libtpu: 0.0.40
codegen_flags: <defaults>
</compile_context>

<pallas_src>
import functools

import jax
import jax.numpy as jnp
from jax.experimental import pallas as pl
from jax.experimental.pallas import tpu as pltpu


_VMEM_LIMIT = 32 * 1024 * 1024          # scoped VMEM request (safe on v5e/v6e/v7x)
_FUSED_SLAB_BUDGET = 16 * 1024 * 1024   # budget for 2x in + 2x out slabs (fused path)


def _tree_sum_to_128(x_blk, acc_ref):
    """Accumulate a (C, tw) tile into the (C, 128) f32 scratch using a
    log-depth chain of lane-tile-aligned VPU adds (no XLU until finalize)."""
    tw = x_blk.shape[-1]
    n = tw // 128
    chunks = [x_blk[:, i * 128:(i + 1) * 128].astype(jnp.float32) for i in range(n)]
    while len(chunks) > 1:
        nxt = [chunks[i] + chunks[i + 1] for i in range(0, len(chunks) - 1, 2)]
        if len(chunks) % 2:
            nxt.append(chunks[-1])
        chunks = nxt
    acc_ref[...] += chunks[0]


def _mlp_att(p, w1t, b1, w2, b2):
    """Squeeze-excite MLP on a pooled column vector p (C, 1) -> att (C, 1).

    Formulated as broadcast-multiply + tiny reductions so there are no
    transposes and no degenerate-shape MXU matmuls:
        h   = relu(W1 @ p + b1)    as a (1, Cr) row   (sublane reduce)
        att = sigmoid(W2 @ h + b2) as a (C, 1) column (lane reduce)
    """
    h = jnp.sum(w1t * p, axis=0, keepdims=True) + b1          # (1, Cr)
    h = jnp.maximum(h, 0.0)
    a = jnp.sum(w2 * h, axis=1, keepdims=True) + b2           # (C, 1)
    return jax.nn.sigmoid(a)


# --------------------------------------------------------------------------
# Multi-pass phase 1: tiled global-avg-pool fused with the squeeze-excite MLP
# --------------------------------------------------------------------------
def _pool_mlp_kernel(x_ref, w1t_ref, b1_ref, w2_ref, b2_ref, att_ref, acc_ref,
                     *, inv_hw, last_w):
    k = pl.program_id(1)
    kt = pl.num_programs(1)

    @pl.when(k == 0)
    def _init():
        acc_ref[...] = jnp.zeros_like(acc_ref)

    x_blk = x_ref[0]                       # (C, tw), input dtype
    tw = x_blk.shape[-1]

    if last_w == tw:
        # Every spatial tile is fully valid.
        _tree_sum_to_128(x_blk, acc_ref)
    else:
        # Ragged last tile: out-of-bounds lanes of the input block are
        # undefined, so mask them.  Only the final tile pays for the mask.
        @pl.when(k < kt - 1)
        def _full():
            _tree_sum_to_128(x_blk, acc_ref)

        @pl.when(k == kt - 1)
        def _masked():
            lane = jax.lax.broadcasted_iota(jnp.int32, x_blk.shape, 1)
            masked = jnp.where(lane < last_w, x_blk, jnp.zeros_like(x_blk))
            _tree_sum_to_128(masked, acc_ref)

    @pl.when(k == kt - 1)
    def _finalize():
        # Single XLU cross-lane reduce per batch element, divide by TRUE H*W,
        # then the fused MLP (tiny; hides under the last tile's DMA).
        p = jnp.sum(acc_ref[...], axis=-1, keepdims=True) * inv_hw      # (C, 1)
        att_ref[0] = _mlp_att(p, w1t_ref[...], b1_ref[...],
                              w2_ref[...], b2_ref[...])                 # (C, 1)


# --------------------------------------------------------------------------
# Multi-pass phase 2: broadcast multiply x * attention weights
# --------------------------------------------------------------------------
def _apply_kernel(x_ref, att_ref, o_ref):
    att = att_ref[0]                                   # (C, 1) f32
    if o_ref.dtype != jnp.float32:
        att = att.astype(o_ref.dtype)                  # bf16 multiply on bf16 inputs
    o_ref[0] = (x_ref[0] * att).astype(o_ref.dtype)


# --------------------------------------------------------------------------
# Fused single-pass kernel (whole (C, H*W) slab of one batch element in VMEM)
# --------------------------------------------------------------------------
def _fused_kernel(x_ref, w1t_ref, b1_ref, w2_ref, b2_ref, o_ref, *, inv_hw):
    x_blk = x_ref[0]                                                     # (C, hw)
    p = jnp.sum(x_blk.astype(jnp.float32), axis=-1, keepdims=True) * inv_hw
    att = _mlp_att(p, w1t_ref[...], b1_ref[...], w2_ref[...], b2_ref[...])
    if o_ref.dtype != jnp.float32:
        att = att.astype(o_ref.dtype)
    o_ref[0] = (x_blk * att).astype(o_ref.dtype)


# --------------------------------------------------------------------------
# Wrapper
# --------------------------------------------------------------------------
def ca_layer(x, conv1_w, conv1_b, conv2_w, conv2_b, *, tile_w=8192,
             force_multipass=False):
    """CALayer forward: x * sigmoid(W2 @ relu(W1 @ avgpool(x) + b1) + b2).

    conv1_w: (C//8, C), conv1_b: (C//8,), conv2_w: (C, C//8), conv2_b: (C,).
    """
    B, C, H, W = x.shape
    cr = conv1_w.shape[0]
    hw = H * W
    inv_hw = 1.0 / hw

    # Free (contiguous) reshape: no wrapper pad / slice, no extra HBM passes.
    x_flat = x.reshape(B, C, hw)

    w1t = conv1_w.astype(jnp.float32).T               # (C, Cr)
    b1 = conv1_b.astype(jnp.float32).reshape(1, cr)   # (1, Cr)
    w2 = conv2_w.astype(jnp.float32)                  # (C, Cr)
    b2 = conv2_b.astype(jnp.float32).reshape(C, 1)    # (C, 1)
    mlp_args = (w1t, b1, w2, b2)
    mlp_specs = [pl.BlockSpec((C, cr), lambda b, *_: (0, 0)),
                 pl.BlockSpec((1, cr), lambda b, *_: (0, 0)),
                 pl.BlockSpec((C, cr), lambda b, *_: (0, 0)),
                 pl.BlockSpec((C, 1), lambda b, *_: (0, 0))]

    slab_bytes = C * hw * x.dtype.itemsize
    use_fused = ((4 * slab_bytes <= _FUSED_SLAB_BUDGET or hw < 128)
                 and (not force_multipass or hw < 128))

    if use_fused:
        # Single pass: 1 HBM read + 1 write of x (vs 2R + 1W below).
        y = pl.pallas_call(
            functools.partial(_fused_kernel, inv_hw=inv_hw),
            out_shape=jax.ShapeDtypeStruct((B, C, hw), x.dtype),
            grid=(B,),
            in_specs=[pl.BlockSpec((1, C, hw), lambda b: (b, 0, 0))] + mlp_specs,
            out_specs=pl.BlockSpec((1, C, hw), lambda b: (b, 0, 0)),
            compiler_params=pltpu.CompilerParams(
                dimension_semantics=("parallel",),
                vmem_limit_bytes=_VMEM_LIMIT),
        )(x_flat, *mlp_args)
        return y.reshape(B, C, H, W)

    # ---- multi-pass path: lane-dense spatial tiles, ragged tail in-kernel ----
    if hw % 128 == 0:
        tw = min(tile_w, hw)
    else:
        tw = min(tile_w, (hw // 128) * 128)            # hw >= 128 here
    kt = -(-hw // tw)
    last_w = hw - (kt - 1) * tw                        # width of the final tile

    # phase 1: pooled attention weights (B, C, 1), MLP fused into the finalize.
    att = pl.pallas_call(
        functools.partial(_pool_mlp_kernel, inv_hw=inv_hw, last_w=last_w),
        out_shape=jax.ShapeDtypeStruct((B, C, 1), jnp.float32),
        grid=(B, kt),
        in_specs=[pl.BlockSpec((1, C, tw), lambda b, k: (b, 0, k))] + mlp_specs,
        out_specs=pl.BlockSpec((1, C, 1), lambda b, k: (b, 0, 0)),
        scratch_shapes=[pltpu.VMEM((C, 128), jnp.float32)],
        compiler_params=pltpu.CompilerParams(
            dimension_semantics=("parallel", "arbitrary"),
            vmem_limit_bytes=_VMEM_LIMIT),
    )(x_flat, *mlp_args)
    # TODO(synk): when B < 2 on v7x, split the reduction axis across both
    # TensorCores (two partial accumulators) so phase 1 uses the full chip.

    # phase 2: broadcast multiply; out-of-bounds lanes of the ragged last
    # output block are dropped by Pallas, so the output is true hw wide.
    y = pl.pallas_call(
        _apply_kernel,
        out_shape=jax.ShapeDtypeStruct((B, C, hw), x.dtype),
        grid=(B, kt),
        in_specs=[pl.BlockSpec((1, C, tw), lambda b, k: (b, 0, k)),
                  pl.BlockSpec((1, C, 1), lambda b, k: (b, 0, 0))],
        out_specs=pl.BlockSpec((1, C, tw), lambda b, k: (b, 0, k)),
        compiler_params=pltpu.CompilerParams(
            dimension_semantics=("parallel", "parallel"),
            vmem_limit_bytes=_VMEM_LIMIT),
    )(x_flat, att)
    return y.reshape(B, C, H, W)


if __name__ == "__main__":
    B, C, H, W = 2, 64, 13, 21        # FFA-Net channel width = 64; H*W = 273 (ragged)
    Cr = C // 8

    key = jax.random.PRNGKey(0)
    k1, k2, k3, k4, k5 = jax.random.split(key, 5)
    x = jax.random.normal(k1, (B, C, H, W), jnp.float32)
    conv1_w = jax.random.normal(k2, (Cr, C), jnp.float32) * 0.1
    conv1_b = jax.random.normal(k3, (Cr,), jnp.float32) * 0.1
    conv2_w = jax.random.normal(k4, (C, Cr), jnp.float32) * 0.1
    conv2_b = jax.random.normal(k5, (C,), jnp.float32) * 0.1

    # Pure-JAX reference (same math as the PyTorch module).
    p_ref = x.mean(axis=(2, 3))                                  # (B, C)
    h_ref = jnp.maximum(p_ref @ conv1_w.T + conv1_b, 0.0)        # (B, Cr)
    a_ref = jax.nn.sigmoid(h_ref @ conv2_w.T + conv2_b)          # (B, C)
    y_ref = x * a_ref[:, :, None, None]

    # Fused single-pass path (per-batch slab fits in VMEM).
    y_fused = jax.block_until_ready(ca_layer(x, conv1_w, conv1_b, conv2_w, conv2_b))
    err_f = float(jnp.max(jnp.abs(y_fused - y_ref)))
    assert err_f < 1e-4, f"fused path max abs error too large: {err_f}"

    # Multi-pass tiled path, forced, with a ragged (17-lane) last spatial tile.
    y_multi = jax.block_until_ready(
        ca_layer(x, conv1_w, conv1_b, conv2_w, conv2_b,
                 tile_w=256, force_multipass=True))
    err_m = float(jnp.max(jnp.abs(y_multi - y_ref)))
    assert err_m < 1e-4, f"multi-pass path max abs error too large: {err_m}"

    print("KERNEL_OK")
</pallas_src>

<mosaic_0001>
module attributes {stable_mosaic.version = 11 : i64} {
  func.func @_fused_kernel(%arg0: i32, %arg1: memref<1x64x273xf32, #tpu.memory_space<vmem>>, %arg2: memref<64x8xf32, #tpu.memory_space<vmem>>, %arg3: memref<1x8xf32, #tpu.memory_space<vmem>>, %arg4: memref<64x8xf32, #tpu.memory_space<vmem>>, %arg5: memref<64x1xf32, #tpu.memory_space<vmem>>, %arg6: memref<1x64x273xf32, #tpu.memory_space<vmem>>) attributes {dimension_semantics = [#tpu.dimension_semantics<parallel>], iteration_bounds = array<i64: 2>, scalar_prefetch = 0 : i64, scratch_operands = 0 : i64, tpu.core_type = #tpu.core_type<tc>, window_params = [{transform_indices = @transform_0, window_bounds = array<i64: 1, 64, 273>}, {pipeline_mode = #tpu.pipeline_mode<synchronous>, transform_indices = @transform_1, window_bounds = array<i64: 64, 8>}, {pipeline_mode = #tpu.pipeline_mode<synchronous>, transform_indices = @transform_2, window_bounds = array<i64: 1, 8>}, {pipeline_mode = #tpu.pipeline_mode<synchronous>, transform_indices = @transform_3, window_bounds = array<i64: 64, 8>}, {pipeline_mode = #tpu.pipeline_mode<synchronous>, transform_indices = @transform_4, window_bounds = array<i64: 64, 1>}, {transform_indices = @transform_5, window_bounds = array<i64: 1, 64, 273>}]} {
    %c0 = arith.constant 0 : index
    %c0_0 = arith.constant 0 : index
    %c0_1 = arith.constant 0 : index
    %0 = vector.load %arg1[%c0, %c0_0, %c0_1] : memref<1x64x273xf32, #tpu.memory_space<vmem>>, vector<1x64x273xf32>
    %1 = vector.shape_cast %0 : vector<1x64x273xf32> to vector<64x273xf32>
    %cst = arith.constant dense<0.000000e+00> : vector<64xf32>
    %2 = vector.multi_reduction <add>, %1, %cst [1] : vector<64x273xf32> to vector<64xf32>
    %3 = vector.shape_cast %2 : vector<64xf32> to vector<64x1xf32>
    %cst_2 = arith.constant 0.00366300368 : f32
    %4 = vector.broadcast %cst_2 : f32 to vector<64x1xf32>
    %5 = arith.mulf %3, %4 : vector<64x1xf32>
    %c0_3 = arith.constant 0 : index
    %c0_4 = arith.constant 0 : index
    %6 = vector.load %arg2[%c0_3, %c0_4] : memref<64x8xf32, #tpu.memory_space<vmem>>, vector<64x8xf32>
    %c0_5 = arith.constant 0 : index
    %c0_6 = arith.constant 0 : index
    %7 = vector.load %arg3[%c0_5, %c0_6] : memref<1x8xf32, #tpu.memory_space<vmem>>, vector<1x8xf32>
    %c0_7 = arith.constant 0 : index
    %c0_8 = arith.constant 0 : index
    %8 = vector.load %arg4[%c0_7, %c0_8] : memref<64x8xf32, #tpu.memory_space<vmem>>, vector<64x8xf32>
    %c0_9 = arith.constant 0 : index
    %c0_10 = arith.constant 0 : index
    %9 = vector.load %arg5[%c0_9, %c0_10] : memref<64x1xf32, #tpu.memory_space<vmem>>, vector<64x1xf32>
    %10 = vector.broadcast %5 : vector<64x1xf32> to vector<64x8xf32>
    %11 = arith.mulf %6, %10 : vector<64x8xf32>
    %cst_11 = arith.constant dense<0.000000e+00> : vector<8xf32>
    %12 = vector.multi_reduction <add>, %11, %cst_11 [0] : vector<64x8xf32> to vector<8xf32>
    %13 = vector.shape_cast %12 : vector<8xf32> to vector<1x8xf32>
    %14 = arith.addf %13, %7 : vector<1x8xf32>
    %cst_12 = arith.constant 0.000000e+00 : f32
    %15 = vector.broadcast %cst_12 : f32 to vector<1x8xf32>
    %16 = arith.maximumf %14, %15 : vector<1x8xf32>
    %17 = vector.broadcast %16 : vector<1x8xf32> to vector<64x8xf32>
    %18 = arith.mulf %8, %17 : vector<64x8xf32>
    %cst_13 = arith.constant dense<0.000000e+00> : vector<64xf32>
    %19 = vector.multi_reduction <add>, %18, %cst_13 [1] : vector<64x8xf32> to vector<64xf32>
    %20 = vector.shape_cast %19 : vector<64xf32> to vector<64x1xf32>
    %21 = arith.addf %20, %9 : vector<64x1xf32>
    %22 = arith.negf %21 : vector<64x1xf32>
    %23 = math.exp %22 : vector<64x1xf32>
    %cst_14 = arith.constant 1.000000e+00 : f32
    %24 = vector.broadcast %cst_14 : f32 to vector<64x1xf32>
    %25 = arith.addf %24, %23 : vector<64x1xf32>
    %26 = arith.divf %24, %25 : vector<64x1xf32>
    %27 = vector.broadcast %26 : vector<64x1xf32> to vector<64x273xf32>
    %28 = arith.mulf %1, %27 : vector<64x273xf32>
    %c0_15 = arith.constant 0 : index
    %c0_16 = arith.constant 0 : index
    %c0_17 = arith.constant 0 : index
    %29 = vector.load %arg6[%c0_15, %c0_16, %c0_17] : memref<1x64x273xf32, #tpu.memory_space<vmem>>, vector<1x64x273xf32>
    %30 = vector.shape_cast %29 : vector<1x64x273xf32> to vector<64x273xf32>
    %31 = vector.shape_cast %28 : vector<64x273xf32> to vector<1x64x273xf32>
    tpu.vector_store %arg6[%c0_15, %c0_16, %c0_17], %31 {strides = array<i32>} : memref<1x64x273xf32, #tpu.memory_space<vmem>>, vector<1x64x273xf32>,
    return
  }
  func.func @transform_0(%arg0: i32) -> (i32, i32, i32) {
    %c0_i32 = arith.constant 0 : i32
    %c0_i32_0 = arith.constant 0 : i32
    %c0_i32_1 = arith.constant 0 : i32
    return %arg0, %c0_i32, %c0_i32_0 : i32, i32, i32
  }
  func.func @transform_1(%arg0: i32) -> (i32, i32) {
    %c0_i32 = arith.constant 0 : i32
    %c0_i32_0 = arith.constant 0 : i32
    %c0_i32_1 = arith.constant 0 : i32
    return %c0_i32, %c0_i32_0 : i32, i32
  }
  func.func @transform_2(%arg0: i32) -> (i32, i32) {
    %c0_i32 = arith.constant 0 : i32
    %c0_i32_0 = arith.constant 0 : i32
    %c0_i32_1 = arith.constant 0 : i32
    return %c0_i32, %c0_i32_0 : i32, i32
  }
  func.func @transform_3(%arg0: i32) -> (i32, i32) {
    %c0_i32 = arith.constant 0 : i32
    %c0_i32_0 = arith.constant 0 : i32
    %c0_i32_1 = arith.constant 0 : i32
    return %c0_i32, %c0_i32_0 : i32, i32
  }
  func.func @transform_4(%arg0: i32) -> (i32, i32) {
    %c0_i32 = arith.constant 0 : i32
    %c0_i32_0 = arith.constant 0 : i32
    %c0_i32_1 = arith.constant 0 : i32
    return %c0_i32, %c0_i32_0 : i32, i32
  }
  func.func @transform_5(%arg0: i32) -> (i32, i32, i32) {
    %c0_i32 = arith.constant 0 : i32
    %c0_i32_0 = arith.constant 0 : i32
    %c0_i32_1 = arith.constant 0 : i32
    return %arg0, %c0_i32, %c0_i32_0 : i32, i32, i32
  }
}

</mosaic_0001>

<bundles_post_ra>
// kernel: tpu_custom_call.1
= control target key start
LH: loop header
LB: loop body
LE: loop exit
PB: predicated region body
PF: predicated region fallthrough
CT: control target
= control target key end

     0   :  { %10 = vsyncpa [#allocation3], 0  ;;  %s1284_s0 = inlined_call_operand.hbm [shape: f32[2,64,273], index: 0, kind: input, shape index: {}]   ;;  %s1285_s1 = inlined_call_operand.vmem [shape: f32[64,8], index: 1, kind: input, shape index: {}]   ;;  %s1286_s2 = inlined_call_operand.vmem [shape: f32[1,8], index: 2, kind: input, shape index: {}]   ;;  %s1287_s3 = inlined_call_operand.vmem [shape: f32[64,8], index: 3, kind: input, shape index: {}]   ;;  %s1288_s4 = inlined_call_operand.vmem [shape: f32[64,1], index: 4, kind: input, shape index: {}]   ;;  %s1289_s5 = inlined_call_operand.hbm [shape: f32[2,64,273], index: 5, kind: output, shape index: {}]  }
   0x1   :  { %12 = vsyncpa [#allocation3 + $0x1], 0 }
   0x2   :  { %13 = vsyncpa [#allocation4], 0 }
   0x3   :  { %15 = vsyncpa [#allocation4 + $0x1], 0  ;;  %s876_s18 = smov 0   ;;  %s878_s19 = smov 0  }
   0x4   :  { %s880_s20 = smov 0   ;;  %s882_s21 = smov 0  }
   0x5 LB: > { %s897_s22 = sadd.s32 4294967295, %s837_s21   ;;  %s640_s23 = sadd.s32 4294967294, %s837_s21   ;;  %s837_s21 = sphi %s882_s21, %s1303_s21   ;;  %s833_s20 = sphi %s880_s20, %s1302_s20   ;;  %s829_s19 = sphi %s878_s19, %s1301_s19   ;;  %s825_s18 = sphi %s876_s18, %s1300_s18  }
   0x6   : > { %s901_s24 = sadd.s32 1, %s837_s21   ;;  %s28_s25 = sadd.s32 1, %s833_s20 }
   0x7   : > { %s25_s26 = ssub.s32 %s837_s21, %s901_s24  ;;  %p35_p0 = scmp.ne.s32.totalorder %s833_s20, %s829_s19 }
   0x8   : > { %p26_p1 = scmp.eq.s32.totalorder %s25_s26, 0  ;;  %p36_p2 = scmp.eq.s32.totalorder %s837_s21, 0 }
   0x9   : > { %p41_p3 = scmp.ne.s32.totalorder %s829_s19, %s825_s18  ;;  %p42_p4 = scmp.eq.s32.totalorder %s897_s22, 0 }
   0xa   : > { %s913_s27 = scalar_select %p26_p1, %s833_s20, %s28_s25  }
   0xb   : > { %p37_p5 = por %p36_p2, %p35_p0  ;;  %p915_p6 = por %p42_p4, %p41_p3 }
   0xc   : > { %p149_p7 = scmp.eq.s32.totalorder %s897_s22, 1  ;;  %p155_p8 = scmp.eq.s32.totalorder %s640_s23, 1 }
   0xd   : > { %s1292_s28 = scalar_select %p915_p6, 1, 0 }
   0xe   : > { %p672_p10 = scmp.lt.s32.totalorder %s837_s21, 2  ;;  %p922_p11 = por %p149_p7, %p35_p0 }
   0xf   : > { %p926_p12 = por %p155_p8, %p41_p3  ;;  %s187_s6 = sand.u32 1, %s833_s20  }
  0x10   : > { %s1293_s29 = scalar_select %p922_p11, 1, 0 }
  0x11   : > { %s1294_s30 = scalar_select %p926_p12, 1, 0 }
  0x12   : > { %s657_s7 = smul.u32 3072, %s837_s21  ;;  %p937_p13 = pnand %p672_p10, %p37_p5 }
  0x13   : > { %s656_s8 = smul.u32 192, %s187_s6  ;;  %s943_s15 = scalar_lea.sflag [#allocation3], %s187_s6 }
  0x14   : > { %s935_s11 = scalar_lea.hbm %s1284_s0, %s657_s7  ;;  %p747_p1 = pneg %p937_p13 }
  0x15   : > { %s191_s13 = scalar_lea.vmem [#allocation2], %s656_s8  ;;  %s745_s16 = scalar_lea.hbm %s935_s11, 3072 }
  0x16   : > { %s198_s14 = sshll.u32 %s191_s13, 4  ;;  %p746_p0 = scmp.ne.s32.totalorder %s935_s11, %s745_s16  ;;  %s941_s14 = int_to_ptr.vmem [resolvable:$true] %s198_s14 }
  0x17   : > { %s750_s25 = scalar_lea.hbm %s1284_s0, 6144  ;;  %p751_p4 = scmp.lt.s32.totalorder %s935_s11, %s1284_s0 }
  0x18   : > { %p748_p2 = pnand %p747_p1, %p746_p0  ;;  %p752_p5 = scmp.lt.s32.totalorder %s750_s25, %s745_s16 }
  0x1a   : > { %p749_p3 = pneg %p748_p2  ;;  %p753_p7 = por %p752_p5, %p751_p4 }
  0x1c   : > { %p754_p8 = pnand %p753_p7, %p749_p3 }
  0x1e   : > { %757 = shalt.err (!%p754_p8)
}
  0x1f   : > { %s758_s6 = scalar_lea.vmem %s941_s14, 3072  ;;  %s839_s8 = smov [#allocation2]  }
  0x20   : > { %p759_p10 = scmp.ne.s32.totalorder %s941_s14, %s758_s6  ;;  %s763_s9 = sshll.u32 %s839_s8, 4  ;;  %s764_s9 = int_to_ptr.vmem [resolvable:$false] %s763_s9 }
  0x21   : > { %s765_s10 = scalar_lea.vmem %s764_s9, 6144  ;;  %p766_p2 = scmp.lt.s32.totalorder %s941_s14, %s764_s9 }
  0x22   : > { %p761_p9 = pnand %p759_p10, %p747_p1  ;;  %p767_p12 = scmp.lt.s32.totalorder %s765_s10, %s758_s6 }
  0x24   : > { %p762_p0 = pneg %p761_p9  ;;  %p768_p11 = por %p767_p12, %p766_p2 }
  0x26   : > { %p769_p6 = pnand %p768_p11, %p762_p0 }
  0x28   : > { %772 = shalt.err (!%p769_p6)
}
  0x29   : > { %s840_s13 = smov 384   ;;  %s841_s16 = smov 24  }
  0x2a   : > { %667 = dma.hbm_to_vmem [thread:$0]  (!%p937_p13), %s935_s11, 3072, %s941_s14, %s943_s15, %s840_s13, %s840_s13, %s841_s16  }
  0x2b   : > { %p644_p9 = scmp.ge.s32.totalorder %s837_s21, 1  ;;  %p206_p1 = scmp.lt.s32.totalorder %s837_s21, 3 }
  0x2d   : > { %p207_p3 = pnand %p644_p9, %p206_p1 }
  0x2e   : > { %s967_s17 = sand.u32 (!%p207_p3), 1, %s829_s19   ;;  %p1296_p6 = scmp.ne.s32.totalorder (!%p207_p3), %s1292_s28, 0 }
  0x2f   : > { %210 = sbr.rel (%p207_p3) target bundleno = 578 (0x242), region = 40  ;;  %s213_s25 = scalar_lea.sflag (!%p207_p3), [#allocation3], %s967_s17 }
  0x30   : > { %s658_s23 = smul.u32 (!%p207_p3), 192, %s967_s17 }
  0x32   : > { %s973_s26 = scalar_lea.vmem (!%p207_p3), [#allocation2], %s658_s23 }
  0x34   : > { %816 = dma.done.wait (%p1296_p6), %s213_s25, 3072  }
  0x35   : > { %818 = vsyncadd (%p1296_p6), %s213_s25, 4294964224  ;;  %vm268_vm0 = vcmask 138240   ;;  %v980_v0 = vld [vmem:[%s973_s26] sm:$0xff]  ;;  %v983_v1 = vld [vmem:[%s973_s26 + $0x8] sm:$0xff]  ;;  %vm349_vm1 = vcmask 64512   ;;  %s1182_s9 = scalar_lea.vmem [#allocation5], %s658_s23 }
  0x36   : > { %v986_v2 = vld [vmem:[%s973_s26 + $0x10] sm:$0xff]  ;;  %v267_v3 = vadd.f32 %v983_v1, %v980_v0  ;;  %v996_v6 = vld [vmem:[%s973_s26 + $0x38] sm:$0xff]  ;;  %v999_v7 = vld [vmem:[%s973_s26 + $0x40] sm:$0xff]  ;;  %s659_s23 = smul.u32 3072, %s897_s22  ;;  %s567_s10 = sshll.u32 %s1182_s9, 4  ;;  %s1234_s10 = int_to_ptr.vmem [resolvable:$true] %s567_s10 }
  0x37   : > { %v269_v4 = vsel %vm268_vm0, %v986_v2, 0.0  ;;  %v993_v5 = vld [vmem:[%s973_s26 + $0x30] sm:$0xff]  ;;  %v279_v9 = vsel %vm268_vm0, %v999_v7, 0.0  ;;  %v1006_v10 = vld [vmem:[%s973_s26 + $0x18] sm:$0xff]  ;;  %v1009_v11 = vld [vmem:[%s973_s26 + $0x20] sm:$0xff]  ;;  %s554_s22 = scalar_lea.sflag [#allocation4], %s967_s17 }
  0x38   : > { %v278_v8 = vadd.f32 %v996_v6, %v993_v5  ;;  %v1012_v12 = vld [vmem:[%s973_s26 + $0x28] sm:$0xff]  ;;  %v270_v13 = vadd.f32 %v269_v4, %v267_v3  ;;  %v273_v14 = vadd.f32 %v1009_v11, %v1006_v10  ;;  %v1022_v17 = vld [vmem:[%s973_s26 + $0x50] sm:$0xff]  ;;  %v1025_v18 = vld [vmem:[%s973_s26 + $0x58] sm:$0xff]  ;;  %s1232_s25 = scalar_lea.hbm %s1289_s5, %s659_s23  ;;  %p1297_p12 = scmp.ne.s32.totalorder %s1293_s29, 0 }
  0x39   : > { %v274_v15 = vsel %vm268_vm0, %v1012_v12, 0.0  ;;  %v1019_v16 = vld [vmem:[%s973_s26 + $0x48] sm:$0xff]  ;;  %v284_v21 = vsel %vm268_vm0, %v1025_v18, 0.0  ;;  %v1032_v22 = vld [vmem:[%s973_s26 + $0x60] sm:$0xff]  ;;  %v1038_v24 = vld [vmem:[%s973_s26 + $0x70] sm:$0xff]  ;;  %s843_s28 = smov [#allocation5]  }
  0x3a   : > { %v280_v19 = vadd.f32 %v279_v9, %v278_v8  ;;  %v283_v20 = vadd.f32 %v1022_v17, %v1019_v16  ;;  %v1035_v23 = vld [vmem:[%s973_s26 + $0x68] sm:$0xff]  ;;  %271 = vadd.xlane.f32.xlu0 %v270_v13  ;;  %v275_v25 = vadd.f32 %v274_v15, %v273_v14  ;;  %v1043_v27 = vld [vmem:[%s973_s26 + $0x78] sm:$0xff]  ;;  %v1046_v28 = vld [vmem:[%s973_s26 + $0x80] sm:$0xff]  ;;  %v289_v31 = vsel %vm268_vm0, %v1038_v24, 0.0  ;;  %s777_s11 = sshll.u32 %s843_s28, 4  ;;  %s778_s11 = int_to_ptr.vmem [resolvable:$false] %s777_s11 }
  0x3b   : > { %v288_v26 = vadd.f32 %v1035_v23, %v1032_v22  ;;  %v1049_v29 = vld [vmem:[%s973_s26 + $0x88] sm:$0xff]  ;;  %v293_v32 = vadd.f32 %v1046_v28, %v1043_v27  ;;  %v1056_v33 = vld [vmem:[%s973_s26 + $0x90] sm:$0xff]  ;;  %v1059_v34 = vld [vmem:[%s973_s26 + $0x98] sm:$0xff]  ;;  %s779_s12 = scalar_lea.vmem %s778_s11, 6144  ;;  %p780_p5 = scmp.lt.s32.totalorder %s1234_s10, %s778_s11 }
  0x3c   : > { %281 = vadd.xlane.f32.xlu1 %v280_v19  ;;  %v285_v30 = vadd.f32 %v284_v21, %v283_v20  ;;  %v294_v35 = vsel %vm268_vm0, %v1049_v29, 0.0  ;;  %v1064_v36 = vld [vmem:[%s973_s26 + $0xa0] sm:$0xff]  ;;  %v1067_v37 = vld [vmem:[%s973_s26 + $0xa8] sm:$0xff]  ;;  %v1070_v38 = vld [vmem:[%s973_s26 + $0xb0] sm:$0xff]  ;;  %v298_v41 = vadd.f32 %v1059_v34, %v1056_v33 }
  0x3d   : > { %v1073_v39 = vld [vmem:[%s973_s26 + $0xb8] sm:$0xff]  ;;  %v290_v40 = vadd.f32 %v289_v31, %v288_v26  ;;  %v295_v42 = vadd.f32 %v294_v35, %v293_v32  ;;  %v299_v43 = vsel %vm268_vm0, %v1064_v36, 0.0  ;;  %v303_v44 = vadd.f32 %v1070_v38, %v1067_v37  ;;  %v316_v51 = vld [vmem:[%s1285_s1] sm:$0xff]  ;;  %v318_v53 = vld [vmem:[%s1285_s1 + $0x10] sm:$0xff]  ;;  %s773_s26 = scalar_lea.vmem %s1234_s10, 3072 }
  0x3e   : > { %276 = vadd.xlane.f32.xlu0 %v275_v25  ;;  %v304_v45 = vsel %vm268_vm0, %v1073_v39, 0.0  ;;  %v300_v46 = vadd.f32 %v299_v43, %v298_v41  ;;  %v317_v54 = vld [vmem:[%s1285_s1 + $0x8] sm:$0xff]  ;;  %v319_v58 = vld [vmem:[%s1285_s1 + $0x18] sm:$0xff]  ;;  %v320_v3 = vld [vmem:[%s1285_s1 + $0x20] sm:$0xff]  ;;  %p774_p11 = scmp.ne.s32.totalorder %s1234_s10, %s773_s26  ;;  %p781_p7 = scmp.lt.s32.totalorder %s779_s12, %s773_s26 }
  0x3f   : > { %v305_v47 = vadd.f32 %v304_v45, %v303_v44  ;;  %v321_v14 = vld [vmem:[%s1285_s1 + $0x28] sm:$0xff]  ;;  %v322_v32 = vld [vmem:[%s1285_s1 + $0x30] sm:$0xff] }
  0x40   : > { %286 = vadd.xlane.f32.xlu1 %v285_v30  ;;  %p775_p13 = pnand %p774_p11, %p1297_p12  ;;  %p782_p8 = por %p781_p7, %p780_p5 }
  0x42   : > { %291 = vadd.xlane.f32.xlu0 %v290_v40  ;;  %p776_p4 = pneg %p775_p13 }
  0x44   : > { %296 = vadd.xlane.f32.xlu1 %v295_v42  ;;  %v323_v42 = vld [vmem:[%s1285_s1 + $0x38] sm:$0xff]  ;;  %p783_p10 = pnand %p782_p8, %p776_p4 }
  0x46   : > { %301 = vadd.xlane.f32.xlu0 %v300_v46 }
  0x48   : > { %306 = vadd.xlane.f32.xlu1 %v305_v47 }
  0xc3   : > { %v272_v48 = vpop.xlane.xlu0 %271 }
  0xc4   : > { %v308_v49 = vmul.f32 0.0036630037, %v272_v48 }
  0xc5   : > { %v282_v50 = vpop.xlane.xlu1 %281 }
  0xc6   : > { %v310_v52 = vmul.f32 0.0036630037, %v282_v50  ;;  %v341_v56 = vmul.f32 %v316_v51, %v308_v49 }
  0xc7   : > { %v277_v55 = vpop.xlane.xlu0 %276 }
  0xc8   : > { %v309_v57 = vmul.f32 0.0036630037, %v277_v55  ;;  %v343_v61 = vmul.f32 %v318_v53, %v310_v52  ;;  %v350_v8 = vsel %vm349_vm1, %v341_v56, 0.0 }
  0xc9   : > { %v287_v59 = vpop.xlane.xlu1 %286 }
  0xca   : > { %v311_v60 = vmul.f32 0.0036630037, %v287_v59  ;;  %v342_v62 = vmul.f32 %v317_v54, %v309_v57  ;;  %v353_v21 = vsel %vm349_vm1, %v343_v61, 0.0  ;;  %v373_v57 = vlaneseq }
  0xcb   : > { %v292_v4 = vpop.xlane.xlu0 %291 }
  0xcc   : > { %v344_v63 = vmul.f32 %v319_v58, %v311_v60  ;;  %v351_v9 = vsel %vm349_vm1, %v342_v62, 0.0  ;;  %v312_v13 = vmul.f32 0.0036630037, %v292_v4  ;;  %v374_v60 = vshrl.u32 %v373_v57, 7  ;;  %v324_v62 = vld [vmem:[%s1286_s2] sm:$0x1] }
  0xcd   : > { %v297_v15 = vpop.xlane.xlu1 %296  ;;  %v352_v19 = vadd.f32 %v351_v9, %v350_v8  ;;  %v326_v9 = vld [vmem:[%s1287_s3 + $0x8] sm:$0xff] }
  0xce   : > { %v313_v20 = vmul.f32 0.0036630037, %v297_v15  ;;  %v355_v25 = vsel %vm349_vm1, %v344_v63, 0.0  ;;  %v345_v26 = vmul.f32 %v320_v3, %v312_v13  ;;  %v375_v3 = vsub.s32 0, %v374_v60  ;;  %v325_v13 = vld [vmem:[%s1287_s3] sm:$0xff]  ;;  %v328_v15 = vld [vmem:[%s1287_s3 + $0x18] sm:$0xff] }
  0xcf   : > { %v354_v30 = vadd.f32 %v353_v21, %v352_v19  ;;  %v302_v35 = vpop.xlane.xlu0 %301  ;;  %v327_v19 = vld [vmem:[%s1287_s3 + $0x10] sm:$0xff] }
  0xd0   : > { %v346_v31 = vmul.f32 %v321_v14, %v313_v20  ;;  %v357_v40 = vsel %vm349_vm1, %v345_v26, 0.0  ;;  %v314_v41 = vmul.f32 0.0036630037, %v302_v35  ;;  %v329_v35 = vld [vmem:[%s1287_s3 + $0x20] sm:$0xff]  ;;  %v335_v60 = vld [vmem:[%s1288_s4 + $0x10] sm:$0xff] }
  0xd1   : > { %v307_v43 = vpop.xlane.xlu1 %306  ;;  %v356_v44 = vadd.f32 %v355_v25, %v354_v30 }
  0xd2   : > { %v315_v45 = vmul.f32 0.0036630037, %v307_v43  ;;  %v359_v46 = vsel %vm349_vm1, %v346_v31, 0.0  ;;  %v347_v47 = vmul.f32 %v322_v32, %v314_v41  ;;  %v330_v32 = vld [vmem:[%s1287_s3 + $0x28] sm:$0xff] }
  0xd3   : > { %v358_v48 = vadd.f32 %v357_v40, %v356_v44  ;;  %v332_v44 = vld [vmem:[%s1287_s3 + $0x38] sm:$0xff] }
  0xd4   : > { %v348_v49 = vmul.f32 %v323_v42, %v315_v45  ;;  %v361_v50 = vsel %vm349_vm1, %v347_v47, 0.0  ;;  %v331_v45 = vld [vmem:[%s1287_s3 + $0x30] sm:$0xff] }
  0xd5   : > { %v360_v51 = vadd.f32 %v359_v46, %v358_v48 }
  0xd6   : > { %v363_v52 = vsel %vm349_vm1, %v348_v49, 0.0 }
  0xd7   : > { %v362_v53 = vadd.f32 %v361_v50, %v360_v51 }
  0xd9   : > { %v364_v54 = vadd.f32 %v363_v52, %v362_v53  ;;  %v842_v52 = vmov 0   ;;  %v334_v53 = vld [vmem:[%s1288_s4 + $0x8] sm:$0xff] }
  0xda   : > { %712 = vset.pattern.permute.xlu1 %v842_v52  ;;  %711 = vset.pattern.permute.xlu0 %v842_v52 }
  0xdb   : > { %v365_v55 = vrot.slane %v364_v54, 4 }
  0xdd   : > { %v366_v56 = vadd.f32 %v365_v55, %v364_v54  ;;  %v333_v54 = vld [vmem:[%s1288_s4] sm:$0xff] }
  0xdf   : > { %v367_v58 = vrot.slane %v366_v56, 2 }
  0xe1   : > { %v368_v59 = vadd.f32 %v367_v58, %v366_v56 }
  0xe3   : > { %v369_v61 = vrot.slane %v368_v59, 1 }
  0xe5   : > { %v370_v63 = vadd.f32 %v369_v61, %v368_v59  ;;  %v336_v59 = vld [vmem:[%s1288_s4 + $0x18] sm:$0xff] }
  0xe7   : > { %v371_v4 = vadd.f32 %v370_v63, %v324_v62 }
  0xe9   : > { %v372_v8 = vmax.f32 %v371_v4, 0.0 }
  0xeb   : > { %v376_v14 = vrot.slane %v372_v8, %v375_v3 }
  0xed   : > { %v378_v20 = vmul.f32 %v376_v14, %v326_v9  ;;  %v377_v21 = vmul.f32 %v376_v14, %v325_v13  ;;  %v380_v30 = vmul.f32 %v376_v14, %v328_v15  ;;  %v379_v31 = vmul.f32 %v376_v14, %v327_v19  ;;  %v337_v9 = vld [vmem:[%s1288_s4 + $0x20] sm:$0xff]  ;;  %v338_v15 = vld [vmem:[%s1288_s4 + $0x28] sm:$0xff] }
  0xee   : > { %v382_v42 = vmul.f32 %v376_v14, %v330_v32  ;;  %v381_v43 = vmul.f32 %v376_v14, %v329_v35  ;;  %v384_v48 = vmul.f32 %v376_v14, %v332_v44  ;;  %v383_v49 = vmul.f32 %v376_v14, %v331_v45 }
  0xef   : > { %v388_v25 = vsel %vm349_vm1, %v378_v20, 0.0  ;;  %v385_v26 = vsel %vm349_vm1, %v377_v21, 0.0  ;;  %v394_v40 = vsel %vm349_vm1, %v380_v30, 0.0  ;;  %v391_v41 = vsel %vm349_vm1, %v379_v31, 0.0 }
  0xf0   : > { %389 = vadd.xlane.f32.xlu1 %v388_v25  ;;  %386 = vadd.xlane.f32.xlu0 %v385_v26  ;;  %v400_v46 = vsel %vm349_vm1, %v382_v42, 0.0  ;;  %v397_v47 = vsel %vm349_vm1, %v381_v43, 0.0  ;;  %v406_v50 = vsel %vm349_vm1, %v384_v48, 0.0  ;;  %v403_v51 = vsel %vm349_vm1, %v383_v49, 0.0  ;;  %v339_v26 = vld [vmem:[%s1288_s4 + $0x30] sm:$0xff] }
  0xf4   : > { %395 = vadd.xlane.f32.xlu1 %v394_v40  ;;  %392 = vadd.xlane.f32.xlu0 %v391_v41  ;;  %v340_v40 = vld [vmem:[%s1288_s4 + $0x38] sm:$0xff] }
  0xf8   : > { %401 = vadd.xlane.f32.xlu1 %v400_v46  ;;  %398 = vadd.xlane.f32.xlu0 %v397_v47 }
  0xfc   : > { %407 = vadd.xlane.f32.xlu1 %v406_v50  ;;  %404 = vadd.xlane.f32.xlu0 %v403_v51 }
 0x179   : > { %v390_v55 = vpop.xlane.xlu1 %389  ;;  %v387_v56 = vpop.xlane.xlu0 %386 }
 0x17a   : > { %v410_v57 = vadd.f32 %v390_v55, %v334_v53  ;;  %v409_v58 = vadd.f32 %v387_v56, %v333_v54 }
 0x17c   : > { %v646_v61 = vmul.f32 -1.442695, %v410_v57  ;;  %v645_v62 = vmul.f32 -1.442695, %v409_v58 }
 0x17d   : > { %v396_v63 = vpop.xlane.xlu1 %395  ;;  %v393_v3 = vpop.xlane.xlu0 %392 }
 0x17e   : > { %713 = vpow2.f32 %v646_v61  ;;  %v412_v4 = vadd.f32 %v396_v63, %v336_v59  ;;  %v411_v8 = vadd.f32 %v393_v3, %v335_v60 }
 0x17f   : > { %715 = vpow2.f32 %v645_v62 }
 0x180   : > { %v648_v13 = vmul.f32 -1.442695, %v412_v4  ;;  %v647_v14 = vmul.f32 -1.442695, %v411_v8 }
 0x181   : > { %v402_v19 = vpop.xlane.xlu1 %401  ;;  %v399_v20 = vpop.xlane.xlu0 %398 }
 0x182   : > { %717 = vpow2.f32 %v648_v13  ;;  %v413_v21 = vadd.f32 %v399_v20, %v337_v9  ;;  %v414_v25 = vadd.f32 %v402_v19, %v338_v15 }
 0x183   : > { %719 = vpow2.f32 %v647_v14 }
 0x184   : > { %v649_v30 = vmul.f32 -1.442695, %v413_v21  ;;  %v650_v35 = vmul.f32 -1.442695, %v414_v25 }
 0x185   : > { %v405_v31 = vpop.xlane.xlu0 %404  ;;  %v408_v41 = vpop.xlane.xlu1 %407 }
 0x186   : > { %v415_v32 = vadd.f32 %v405_v31, %v339_v26  ;;  %721 = vpow2.f32 %v649_v30  ;;  %v416_v43 = vadd.f32 %v408_v41, %v340_v40 }
 0x187   : > { %723 = vpow2.f32 %v650_v35 }
 0x188   : > { %v651_v42 = vmul.f32 -1.442695, %v415_v32  ;;  %v652_v48 = vmul.f32 -1.442695, %v416_v43 }
 0x18a   : > { %725 = vpow2.f32 %v651_v42 }
 0x18b   : > { %v714_v44 = vpop.eup %713 }
 0x18c   : > { %v716_v45 = vpop.eup %715  ;;  %v442_v46 = vadd.f32 1.0, %v714_v44 }
 0x18d   : > { %v441_v47 = vadd.f32 1.0, %v716_v45 }
 0x18e   : > { %727 = vrcp.f32 %v442_v46 }
 0x18f   : > { %v718_v49 = vpop.eup %717  ;;  %729 = vrcp.f32 %v441_v47 }
 0x190   : > { %v720_v50 = vpop.eup %719  ;;  %731 = vpow2.f32 %v652_v48  ;;  %v444_v52 = vadd.f32 1.0, %v718_v49 }
 0x191   : > { %v443_v51 = vadd.f32 1.0, %v720_v50 }
 0x193   : > { %733 = vrcp.f32 %v443_v51  ;;  %v722_v53 = vpop.eup %721 }
 0x194   : > { %735 = vrcp.f32 %v444_v52  ;;  %v445_v54 = vadd.f32 1.0, %v722_v53  ;;  %v724_v55 = vpop.eup %723 }
 0x195   : > { %v446_v58 = vadd.f32 1.0, %v724_v55 }
 0x196   : > { %737 = vrcp.f32 %v445_v54 }
 0x197   : > { %v726_v56 = vpop.eup %725  ;;  %739 = vrcp.f32 %v446_v58 }
 0x198   : > { %v447_v61 = vadd.f32 1.0, %v726_v56 }
 0x19a   : > { %741 = vrcp.f32 %v447_v61 }
 0x19b   : > { %v728_v57 = vpop.eup %727 }
 0x19c   : > { %v730_v59 = vpop.eup %729  ;;  %472 = vperm.xlu1 %712, %v728_v57  }
 0x19d   : > { %467 = vperm.xlu0 %711, %v730_v59   ;;  %v732_v60 = vpop.eup %731 }
 0x19e   : > { %v448_v63 = vadd.f32 1.0, %v732_v60 }
 0x1a0   : > { %v734_v62 = vpop.eup %733  ;;  %743 = vrcp.f32 %v448_v63 }
 0x1a1   : > { %477 = vperm.xlu1 %712, %v734_v62   ;;  %v736_v3 = vpop.eup %735 }
 0x1a3   : > { %v738_v4 = vpop.eup %737 }
 0x1a4   : > { %v740_v8 = vpop.eup %739 }
 0x1a5   : > { %482 = vperm.xlu1 %712, %v736_v3  }
 0x1a7   : > { %v742_v9 = vpop.eup %741 }
 0x1a9   : > { %487 = vperm.xlu1 %712, %v738_v4  }
 0x1ad   : > { %492 = vperm.xlu1 %712, %v740_v8   ;;  %v744_v13 = vpop.eup %743 }
 0x1b1   : > { %497 = vperm.xlu1 %712, %v742_v9  }
 0x1b5   : > { %502 = vperm.xlu1 %712, %v744_v13  }
 0x217   : > { %v473_v14 = vpop.permute.xlu1 %472 }
 0x218   : > { %v508_v15 = vmul.f32 %v473_v14, %v1006_v10  ;;  %v509_v19 = vmul.f32 %v473_v14, %v1009_v11  ;;  %v510_v20 = vmul.f32 %v473_v14, %v1012_v12  ;;  %v468_v21 = vpop.permute.xlu0 %467 }
 0x219   : > { %v505_v25 = vmul.f32 %v468_v21, %v980_v0  ;;  %v506_v26 = vmul.f32 %v468_v21, %v983_v1  ;;  %v507_v30 = vmul.f32 %v468_v21, %v986_v2 }
 0x21a   : > { %532 = vst [vmem:[%s1182_s9 + $0x18] sm:$0xff] %v508_v15  ;;  %533 = vst [vmem:[%s1182_s9 + $0x20] sm:$0xff] %v509_v19 }
 0x21b   : > { %534 = vst.msk [vmem:[%s1182_s9 + $0x28] sm:$0xff] %vm268_vm0, %v510_v20  ;;  %529 = vst [vmem:[%s1182_s9] sm:$0xff] %v505_v25 }
 0x21c   : > { %530 = vst [vmem:[%s1182_s9 + $0x8] sm:$0xff] %v506_v26  ;;  %531 = vst.msk [vmem:[%s1182_s9 + $0x10] sm:$0xff] %vm268_vm0, %v507_v30  ;;  %v478_v0 = vpop.permute.xlu1 %477 }
 0x21d   : > { %v511_v1 = vmul.f32 %v478_v0, %v993_v5  ;;  %v512_v2 = vmul.f32 %v478_v0, %v996_v6  ;;  %v513_v10 = vmul.f32 %v478_v0, %v999_v7 }
 0x21f   : > { %535 = vst [vmem:[%s1182_s9 + $0x30] sm:$0xff] %v511_v1  ;;  %536 = vst [vmem:[%s1182_s9 + $0x38] sm:$0xff] %v512_v2 }
 0x220   : > { %537 = vst.msk [vmem:[%s1182_s9 + $0x40] sm:$0xff] %vm268_vm0, %v513_v10  ;;  %v483_v11 = vpop.permute.xlu1 %482 }
 0x221   : > { %v514_v12 = vmul.f32 %v483_v11, %v1019_v16  ;;  %v515_v31 = vmul.f32 %v483_v11, %v1022_v17  ;;  %v516_v32 = vmul.f32 %v483_v11, %v1025_v18 }
 0x223   : > { %538 = vst [vmem:[%s1182_s9 + $0x48] sm:$0xff] %v514_v12  ;;  %539 = vst [vmem:[%s1182_s9 + $0x50] sm:$0xff] %v515_v31 }
 0x224   : > { %540 = vst.msk [vmem:[%s1182_s9 + $0x58] sm:$0xff] %vm268_vm0, %v516_v32  ;;  %v488_v5 = vpop.permute.xlu1 %487 }
 0x225   : > { %v517_v6 = vmul.f32 %v488_v5, %v1032_v22  ;;  %v518_v7 = vmul.f32 %v488_v5, %v1035_v23  ;;  %v519_v35 = vmul.f32 %v488_v5, %v1038_v24 }
 0x227   : > { %541 = vst [vmem:[%s1182_s9 + $0x60] sm:$0xff] %v517_v6  ;;  %542 = vst [vmem:[%s1182_s9 + $0x68] sm:$0xff] %v518_v7 }
 0x228   : > { %543 = vst.msk [vmem:[%s1182_s9 + $0x70] sm:$0xff] %vm268_vm0, %v519_v35  ;;  %v493_v16 = vpop.permute.xlu1 %492 }
 0x229   : > { %v520_v17 = vmul.f32 %v493_v16, %v1043_v27  ;;  %v521_v18 = vmul.f32 %v493_v16, %v1046_v28  ;;  %v522_v40 = vmul.f32 %v493_v16, %v1049_v29 }
 0x22b   : > { %544 = vst [vmem:[%s1182_s9 + $0x78] sm:$0xff] %v520_v17  ;;  %545 = vst [vmem:[%s1182_s9 + $0x80] sm:$0xff] %v521_v18 }
 0x22c   : > { %546 = vst.msk [vmem:[%s1182_s9 + $0x88] sm:$0xff] %vm268_vm0, %v522_v40  ;;  %v498_v22 = vpop.permute.xlu1 %497 }
 0x22d   : > { %v523_v23 = vmul.f32 %v498_v22, %v1056_v33  ;;  %v524_v24 = vmul.f32 %v498_v22, %v1059_v34  ;;  %v525_v27 = vmul.f32 %v498_v22, %v1064_v36 }
 0x22f   : > { %547 = vst [vmem:[%s1182_s9 + $0x90] sm:$0xff] %v523_v23  ;;  %548 = vst [vmem:[%s1182_s9 + $0x98] sm:$0xff] %v524_v24 }
 0x230   : > { %549 = vst.msk [vmem:[%s1182_s9 + $0xa0] sm:$0xff] %vm268_vm0, %v525_v27  ;;  %v503_v28 = vpop.permute.xlu1 %502 }
 0x231   : > { %v526_v29 = vmul.f32 %v503_v28, %v1067_v37  ;;  %v527_v33 = vmul.f32 %v503_v28, %v1070_v38  ;;  %v528_v34 = vmul.f32 %v503_v28, %v1073_v39 }
 0x233   : > { %550 = vst [vmem:[%s1182_s9 + $0xa8] sm:$0xff] %v526_v29  ;;  %551 = vst [vmem:[%s1182_s9 + $0xb0] sm:$0xff] %v527_v33 }
 0x234   : > { %552 = vst.msk [vmem:[%s1182_s9 + $0xb8] sm:$0xff] %vm268_vm0, %v528_v34 }
 0x235   : > { %786 = shalt.err (!%p783_p10)
}
 0x236   : > { %s787_s14 = scalar_lea.hbm %s1232_s25, 3072  ;;  %s791_s6 = scalar_lea.hbm %s1289_s5, 6144 }
 0x237   : > { %p788_p0 = scmp.ne.s32.totalorder %s1232_s25, %s787_s14  ;;  %p792_p1 = scmp.lt.s32.totalorder %s1232_s25, %s1289_s5 }
 0x238   : > { %p793_p3 = scmp.lt.s32.totalorder %s791_s6, %s787_s14 }
 0x239   : > { %p789_p2 = pnand %p788_p0, %p1297_p12 }
 0x23a   : > { %p794_p6 = por %p793_p3, %p792_p1 }
 0x23b   : > { %p790_p9 = pneg %p789_p2 }
 0x23d   : > { %p795_p11 = pnand %p794_p6, %p790_p9 }
 0x23f   : > { %798 = shalt.err (!%p795_p11)
}
 0x240   : > { %s844_s23 = smov 384   ;;  %s845_s13 = smov 24  }
 0x241   : > { %662 = dma.vmem_to_hbm [thread:$0]  (%p1297_p12), %s1234_s10, 3072, %s1232_s25, %s554_s22, %s844_s23, %s844_s23, %s845_s13  }
 0x242 PF: > { %s582_s16 = sand.u32 1, %s825_s18   ;;  %p1298_p13 = scmp.ne.s32.totalorder %s1294_s30, 0 }
 0x243   : > { %p1299_p4 = scmp.ge.s32.totalorder %s837_s21, 2  ;;  %s583_s26 = scalar_lea.sflag [#allocation4], %s582_s16 }
 0x245   : > { %p669_p5 = pnand %p1299_p4, %p1298_p13 }
 0x247   : > { %p670_p7 = pneg %p669_p5 }
 0x249   : > { %820 = dma.done.wait (%p670_p7), %s583_s26, 3072  }
 0x24a   : > { %822 = vsyncadd (%p670_p7), %s583_s26, 4294964224  ;;  %p18_p8 = scmp.ge.s32.totalorder %s901_s24, 4   ;;  %s1300_s18 = smov %s829_s19 }
 0x24b   : > { %s1301_s19 = smov %s833_s20  ;;  %s1302_s20 = smov %s913_s27 }
 0x24c   : > { %s1303_s21 = smov %s901_s24  ;;  %20 = sbr.rel (!%p18_p8) target bundleno = 5 (0x5), region = 85 }
 0x251   :  { %588 = vsyncpa [#allocation3], 1 }
 0x252   :  { %590 = vsyncpa [#allocation3 + $0x1], 1 }
 0x253   :  { %591 = vsyncpa [#allocation4], 1 }
 0x254   :  { %593 = vsyncpa [#allocation4 + $0x1], 1 }

</bundles_post_ra>
